<compile_context>
chip_gen: v7x
topology: tpu7x:2x2x1
jax: 0.10.0
libtpu: 0.0.40
codegen_flags: <defaults>
</compile_context>

<pallas_src>
import jax
import jax.numpy as jnp
from jax.experimental import pallas as pl
from jax.experimental.pallas import tpu as pltpu

# ---- model dims (from the PyTorch module) -----------------------------------
VOCAB = 50        # synthetic vocab size for the (frozen) embedding table
EMB   = 64        # nn.Embedding dim == LSTM input_size
HID   = 28        # LSTM hidden_size
PROJ  = 12        # nn.Linear out_features
NG    = 4         # LSTM gates (i, f, g, o)

# padded / lane-aligned dims used inside the kernel
GW    = 32        # each gate padded to 32 lanes (HID 28 -> 32)
G4    = NG * GW   # packed gate width = 128 lanes (one vreg-wide tile)
HP    = 32        # h / c width padded to 32 (rows of W_hh^T, W_proj^T)

# small example shapes
BATCH = 2
SEQ   = 8


# ---- Pallas kernel: table gather (pre-loop) + LSTM recurrence + projection ----
def pmodel_kernel(tok_ref,      # SMEM (B, T) int32            (scalar prefetch)
                  proj_ref,     # VMEM (VOCAB, 1, G4) f32      precomputed emb@W_ih^T + b
                  whh_ref,      # VMEM (HP, G4) f32            gate-packed W_hh^T
                  wp_ref,       # VMEM (HP, PROJ) f32          row-padded W_proj^T
                  bp_ref,       # VMEM (1, PROJ) f32
                  out_ref,      # VMEM (B, PROJ) f32
                  gat_sc):      # VMEM scratch (B, G4) f32     gather staging buffer
    B, T = tok_ref.shape
    gw = whh_ref.shape[1] // NG                      # 32

    # hoisted loop invariant: recurrent weight lives in vregs for the whole loop
    whh = whh_ref[...]                               # (HP, G4)

    # ---- hoisted input path: gather x_t @ W_ih^T + b rows for every (b, t) ----
    # (off the recurrence critical path; the per-step body below has no gather,
    #  no SMEM reads and no input-side matmul)
    xw = []
    for t in range(T):                               # T, B are tiny & static
        for b in range(B):
            tok = tok_ref[b, t]                      # SMEM scalar read
            gat_sc[pl.ds(b, 1), :] = proj_ref[tok]   # (1, G4) row gather
        xw.append(gat_sc[...])                       # (B, G4) value -> vregs

    # ---- recurrence: h, c stay in vregs; one (B,32)@(32,128) MXU push / step ---
    h = jnp.zeros((B, gw), jnp.float32)
    c = jnp.zeros((B, gw), jnp.float32)
    for t in range(T):
        gates = xw[t] + jnp.dot(h, whh, preferred_element_type=jnp.float32)

        # static 32-lane gate slices (lane selects; padded lanes stay benign:
        # padded weight rows/cols and padded bias lanes are exactly zero)
        i_g = jax.nn.sigmoid(gates[:, 0 * gw:1 * gw])
        f_g = jax.nn.sigmoid(gates[:, 1 * gw:2 * gw])
        g_g = jnp.tanh(      gates[:, 2 * gw:3 * gw])
        o_g = jax.nn.sigmoid(gates[:, 3 * gw:4 * gw])

        c = f_g * c + i_g * g_g
        h = o_g * jnp.tanh(c)

    # last-step projection (padded rows of wp are zero, padded lanes of h are zero)
    out_ref[...] = (jnp.dot(h, wp_ref[...], preferred_element_type=jnp.float32)
                    + bp_ref[...])


# ---- one-time parameter repacking (call once, reuse the result) ----------------
def pack_params(params):
    emb, w_ih, w_hh, b_ih, b_hh, w_p, b_p = (
        params["emb"], params["w_ih"], params["w_hh"],
        params["b_ih"], params["b_hh"], params["w_proj"], params["b_proj"])

    # gate-packed W_ih^T : (EMB, G4); gate k lives in cols [k*GW, k*GW + HID)
    wih = w_ih.reshape(NG, HID, EMB)
    wih = jnp.pad(wih, ((0, 0), (0, GW - HID), (0, 0)))          # (NG, GW, EMB)
    wih_t = jnp.transpose(wih, (2, 0, 1)).reshape(EMB, G4)       # (64, 128)

    # gate-packed fused bias (b_ih + b_hh) : (1, G4), padded lanes zero
    bias = (b_ih + b_hh).reshape(NG, HID)
    bias = jnp.pad(bias, ((0, 0), (0, GW - HID))).reshape(1, G4)

    # precomputed projected embedding table: emb[tok] @ W_ih^T + b  ==  (emb @ W_ih^T + b)[tok]
    # (legal because the embedding is frozen).  3-D layout so the in-kernel gather
    # is a dynamic index on an untiled leading dim.  ~200 KiB VMEM at VOCAB=50.
    proj_table = (jnp.dot(emb, wih_t, precision=jax.lax.Precision.HIGHEST)
                  + bias).reshape(VOCAB, 1, G4)

    # gate-packed W_hh^T : (HP, G4); padded rows (h lanes >= HID) are zero
    whh = w_hh.reshape(NG, HID, HID)
    whh = jnp.pad(whh, ((0, 0), (0, GW - HID), (0, 0)))          # (NG, GW, HID)
    whh_t = jnp.transpose(whh, (2, 0, 1)).reshape(HID, G4)       # (28, 128)
    whh_t = jnp.pad(whh_t, ((0, HP - HID), (0, 0)))              # (32, 128)

    # projection weight padded to HP rows; bias as (1, PROJ)
    wp = jnp.zeros((HP, PROJ), jnp.float32).at[:HID, :].set(w_p.T)
    bp = b_p.reshape(1, PROJ)

    return proj_table, whh_t, wp, bp


# ---- jitted forward: one pallas_call, no per-call repacking --------------------
@jax.jit
def pmodel_forward(token_ids, packed):
    """token_ids: (B, T) int32, packed = pack_params(params) -> (B, PROJ) float32"""
    proj_table, whh, wp, bp = packed
    B, T = token_ids.shape

    grid_spec = pltpu.PrefetchScalarGridSpec(
        num_scalar_prefetch=1,          # token_ids -> SMEM
        grid=(1,),                      # whole recurrence in one invocation
        in_specs=[
            pl.BlockSpec((VOCAB, 1, G4), lambda i, tok: (0, 0, 0)),  # proj table
            pl.BlockSpec((HP, G4),       lambda i, tok: (0, 0)),     # W_hh^T
            pl.BlockSpec((HP, PROJ),     lambda i, tok: (0, 0)),     # W_proj^T
            pl.BlockSpec((1, PROJ),      lambda i, tok: (0, 0)),     # b_proj
        ],
        out_specs=pl.BlockSpec((B, PROJ), lambda i, tok: (0, 0)),
        scratch_shapes=[
            pltpu.VMEM((B, G4), jnp.float32),   # gather staging buffer
        ],
    )

    return pl.pallas_call(
        pmodel_kernel,
        out_shape=jax.ShapeDtypeStruct((B, PROJ), jnp.float32),
        grid_spec=grid_spec,
        compiler_params=pltpu.CompilerParams(
            dimension_semantics=("arbitrary",)),
    )(token_ids.astype(jnp.int32), proj_table, whh, wp, bp)


# ---- pure-JAX reference (PyTorch LSTM semantics) ------------------------------
def pmodel_reference(token_ids, params):
    emb = jnp.take(params["emb"], token_ids, axis=0)         # (B, T, EMB)
    B, T, _ = emb.shape
    h = jnp.zeros((B, HID), jnp.float32)
    c = jnp.zeros((B, HID), jnp.float32)
    for t in range(T):
        gates = (emb[:, t, :] @ params["w_ih"].T + params["b_ih"]
                 + h @ params["w_hh"].T + params["b_hh"])
        i = jax.nn.sigmoid(gates[:, 0 * HID:1 * HID])
        f = jax.nn.sigmoid(gates[:, 1 * HID:2 * HID])
        g = jnp.tanh(gates[:, 2 * HID:3 * HID])
        o = jax.nn.sigmoid(gates[:, 3 * HID:4 * HID])
        c = f * c + i * g
        h = o * jnp.tanh(c)
    return h @ params["w_proj"].T + params["b_proj"]


def init_params(key):
    ks = jax.random.split(key, 7)
    s_lstm = 1.0 / jnp.sqrt(HID)
    s_proj = 1.0 / jnp.sqrt(HID)
    return {
        "emb":    jax.random.normal(ks[0], (VOCAB, EMB), jnp.float32),
        "w_ih":   jax.random.uniform(ks[1], (4 * HID, EMB), jnp.float32, -s_lstm, s_lstm),
        "w_hh":   jax.random.uniform(ks[2], (4 * HID, HID), jnp.float32, -s_lstm, s_lstm),
        "b_ih":   jax.random.uniform(ks[3], (4 * HID,), jnp.float32, -s_lstm, s_lstm),
        "b_hh":   jax.random.uniform(ks[4], (4 * HID,), jnp.float32, -s_lstm, s_lstm),
        "w_proj": jax.random.uniform(ks[5], (PROJ, HID), jnp.float32, -s_proj, s_proj),
        "b_proj": jax.random.uniform(ks[6], (PROJ,), jnp.float32, -s_proj, s_proj),
    }


if __name__ == "__main__":
    key = jax.random.PRNGKey(0)
    k_tok, k_par = jax.random.split(key)

    token_ids = jax.random.randint(k_tok, (BATCH, SEQ), 0, VOCAB, dtype=jnp.int32)
    params = init_params(k_par)

    # one-time parameter repacking (cached / reused across forward calls)
    packed = jax.block_until_ready(pack_params(params))

    out = pmodel_forward(token_ids, packed)
    out = jax.block_until_ready(out)

    ref = pmodel_reference(token_ids, params)
    assert out.shape == (BATCH, PROJ)
    assert jnp.allclose(out, ref, atol=1e-4, rtol=1e-4), (out, ref)

    print("KERNEL_OK")
</pallas_src>

<mosaic_0001>
module attributes {stable_mosaic.version = 11 : i64} {
  func.func @pmodel_kernel(%arg0: i32, %arg1: memref<2x8xi32, #tpu.memory_space<smem>>, %arg2: memref<50x1x128xf32, #tpu.memory_space<vmem>>, %arg3: memref<32x128xf32, #tpu.memory_space<vmem>>, %arg4: memref<32x12xf32, #tpu.memory_space<vmem>>, %arg5: memref<1x12xf32, #tpu.memory_space<vmem>>, %arg6: memref<2x12xf32, #tpu.memory_space<vmem>>, %arg7: memref<2x128xf32, #tpu.memory_space<vmem>>) attributes {dimension_semantics = [#tpu.dimension_semantics<arbitrary>], iteration_bounds = array<i64: 1>, scalar_prefetch = 1 : i64, scratch_operands = 1 : i64, tpu.core_type = #tpu.core_type<tc>, window_params = [{pipeline_mode = #tpu.pipeline_mode<synchronous>, transform_indices = @transform_0, window_bounds = array<i64: 50, 1, 128>}, {pipeline_mode = #tpu.pipeline_mode<synchronous>, transform_indices = @transform_1, window_bounds = array<i64: 32, 128>}, {pipeline_mode = #tpu.pipeline_mode<synchronous>, transform_indices = @transform_2, window_bounds = array<i64: 32, 12>}, {pipeline_mode = #tpu.pipeline_mode<synchronous>, transform_indices = @transform_3, window_bounds = array<i64: 1, 12>}, {pipeline_mode = #tpu.pipeline_mode<synchronous>, transform_indices = @transform_4, window_bounds = array<i64: 2, 12>}]} {
    %c0 = arith.constant 0 : index
    %c0_0 = arith.constant 0 : index
    %0 = vector.load %arg3[%c0, %c0_0] : memref<32x128xf32, #tpu.memory_space<vmem>>, vector<32x128xf32>
    %c0_1 = arith.constant 0 : index
    %c0_2 = arith.constant 0 : index
    %1 = memref.load %arg1[%c0_1, %c0_2] : memref<2x8xi32, #tpu.memory_space<smem>>
    %2 = arith.index_cast %1 : i32 to index
    %c0_3 = arith.constant 0 : index
    %c0_4 = arith.constant 0 : index
    %3 = vector.load %arg2[%2, %c0_3, %c0_4] : memref<50x1x128xf32, #tpu.memory_space<vmem>>, vector<1x1x128xf32>
    %4 = vector.shape_cast %3 : vector<1x1x128xf32> to vector<1x128xf32>
    %c0_5 = arith.constant 0 : index
    %c0_6 = arith.constant 0 : index
    %5 = vector.load %arg7[%c0_5, %c0_6] : memref<2x128xf32, #tpu.memory_space<vmem>>, vector<1x128xf32>
    tpu.vector_store %arg7[%c0_5, %c0_6], %4 {strides = array<i32>} : memref<2x128xf32, #tpu.memory_space<vmem>>, vector<1x128xf32>,
    %c1 = arith.constant 1 : index
    %c0_7 = arith.constant 0 : index
    %6 = memref.load %arg1[%c1, %c0_7] : memref<2x8xi32, #tpu.memory_space<smem>>
    %7 = arith.index_cast %6 : i32 to index
    %c0_8 = arith.constant 0 : index
    %c0_9 = arith.constant 0 : index
    %8 = vector.load %arg2[%7, %c0_8, %c0_9] : memref<50x1x128xf32, #tpu.memory_space<vmem>>, vector<1x1x128xf32>
    %9 = vector.shape_cast %8 : vector<1x1x128xf32> to vector<1x128xf32>
    %c1_10 = arith.constant 1 : index
    %c0_11 = arith.constant 0 : index
    %10 = vector.load %arg7[%c1_10, %c0_11] : memref<2x128xf32, #tpu.memory_space<vmem>>, vector<1x128xf32>
    tpu.vector_store %arg7[%c1_10, %c0_11], %9 {strides = array<i32>} : memref<2x128xf32, #tpu.memory_space<vmem>>, vector<1x128xf32>,
    %c0_12 = arith.constant 0 : index
    %c0_13 = arith.constant 0 : index
    %11 = vector.load %arg7[%c0_12, %c0_13] : memref<2x128xf32, #tpu.memory_space<vmem>>, vector<2x128xf32>
    %c0_14 = arith.constant 0 : index
    %c1_15 = arith.constant 1 : index
    %12 = memref.load %arg1[%c0_14, %c1_15] : memref<2x8xi32, #tpu.memory_space<smem>>
    %13 = arith.index_cast %12 : i32 to index
    %c0_16 = arith.constant 0 : index
    %c0_17 = arith.constant 0 : index
    %14 = vector.load %arg2[%13, %c0_16, %c0_17] : memref<50x1x128xf32, #tpu.memory_space<vmem>>, vector<1x1x128xf32>
    %15 = vector.shape_cast %14 : vector<1x1x128xf32> to vector<1x128xf32>
    %c0_18 = arith.constant 0 : index
    %c0_19 = arith.constant 0 : index
    %16 = vector.load %arg7[%c0_18, %c0_19] : memref<2x128xf32, #tpu.memory_space<vmem>>, vector<1x128xf32>
    tpu.vector_store %arg7[%c0_18, %c0_19], %15 {strides = array<i32>} : memref<2x128xf32, #tpu.memory_space<vmem>>, vector<1x128xf32>,
    %c1_20 = arith.constant 1 : index
    %c1_21 = arith.constant 1 : index
    %17 = memref.load %arg1[%c1_20, %c1_21] : memref<2x8xi32, #tpu.memory_space<smem>>
    %18 = arith.index_cast %17 : i32 to index
    %c0_22 = arith.constant 0 : index
    %c0_23 = arith.constant 0 : index
    %19 = vector.load %arg2[%18, %c0_22, %c0_23] : memref<50x1x128xf32, #tpu.memory_space<vmem>>, vector<1x1x128xf32>
    %20 = vector.shape_cast %19 : vector<1x1x128xf32> to vector<1x128xf32>
    %c1_24 = arith.constant 1 : index
    %c0_25 = arith.constant 0 : index
    %21 = vector.load %arg7[%c1_24, %c0_25] : memref<2x128xf32, #tpu.memory_space<vmem>>, vector<1x128xf32>
    tpu.vector_store %arg7[%c1_24, %c0_25], %20 {strides = array<i32>} : memref<2x128xf32, #tpu.memory_space<vmem>>, vector<1x128xf32>,
    %c0_26 = arith.constant 0 : index
    %c0_27 = arith.constant 0 : index
    %22 = vector.load %arg7[%c0_26, %c0_27] : memref<2x128xf32, #tpu.memory_space<vmem>>, vector<2x128xf32>
    %c0_28 = arith.constant 0 : index
    %c2 = arith.constant 2 : index
    %23 = memref.load %arg1[%c0_28, %c2] : memref<2x8xi32, #tpu.memory_space<smem>>
    %24 = arith.index_cast %23 : i32 to index
    %c0_29 = arith.constant 0 : index
    %c0_30 = arith.constant 0 : index
    %25 = vector.load %arg2[%24, %c0_29, %c0_30] : memref<50x1x128xf32, #tpu.memory_space<vmem>>, vector<1x1x128xf32>
    %26 = vector.shape_cast %25 : vector<1x1x128xf32> to vector<1x128xf32>
    %c0_31 = arith.constant 0 : index
    %c0_32 = arith.constant 0 : index
    %27 = vector.load %arg7[%c0_31, %c0_32] : memref<2x128xf32, #tpu.memory_space<vmem>>, vector<1x128xf32>
    tpu.vector_store %arg7[%c0_31, %c0_32], %26 {strides = array<i32>} : memref<2x128xf32, #tpu.memory_space<vmem>>, vector<1x128xf32>,
    %c1_33 = arith.constant 1 : index
    %c2_34 = arith.constant 2 : index
    %28 = memref.load %arg1[%c1_33, %c2_34] : memref<2x8xi32, #tpu.memory_space<smem>>
    %29 = arith.index_cast %28 : i32 to index
    %c0_35 = arith.constant 0 : index
    %c0_36 = arith.constant 0 : index
    %30 = vector.load %arg2[%29, %c0_35, %c0_36] : memref<50x1x128xf32, #tpu.memory_space<vmem>>, vector<1x1x128xf32>
    %31 = vector.shape_cast %30 : vector<1x1x128xf32> to vector<1x128xf32>
    %c1_37 = arith.constant 1 : index
    %c0_38 = arith.constant 0 : index
    %32 = vector.load %arg7[%c1_37, %c0_38] : memref<2x128xf32, #tpu.memory_space<vmem>>, vector<1x128xf32>
    tpu.vector_store %arg7[%c1_37, %c0_38], %31 {strides = array<i32>} : memref<2x128xf32, #tpu.memory_space<vmem>>, vector<1x128xf32>,
    %c0_39 = arith.constant 0 : index
    %c0_40 = arith.constant 0 : index
    %33 = vector.load %arg7[%c0_39, %c0_40] : memref<2x128xf32, #tpu.memory_space<vmem>>, vector<2x128xf32>
    %c0_41 = arith.constant 0 : index
    %c3 = arith.constant 3 : index
    %34 = memref.load %arg1[%c0_41, %c3] : memref<2x8xi32, #tpu.memory_space<smem>>
    %35 = arith.index_cast %34 : i32 to index
    %c0_42 = arith.constant 0 : index
    %c0_43 = arith.constant 0 : index
    %36 = vector.load %arg2[%35, %c0_42, %c0_43] : memref<50x1x128xf32, #tpu.memory_space<vmem>>, vector<1x1x128xf32>
    %37 = vector.shape_cast %36 : vector<1x1x128xf32> to vector<1x128xf32>
    %c0_44 = arith.constant 0 : index
    %c0_45 = arith.constant 0 : index
    %38 = vector.load %arg7[%c0_44, %c0_45] : memref<2x128xf32, #tpu.memory_space<vmem>>, vector<1x128xf32>
    tpu.vector_store %arg7[%c0_44, %c0_45], %37 {strides = array<i32>} : memref<2x128xf32, #tpu.memory_space<vmem>>, vector<1x128xf32>,
    %c1_46 = arith.constant 1 : index
    %c3_47 = arith.constant 3 : index
    %39 = memref.load %arg1[%c1_46, %c3_47] : memref<2x8xi32, #tpu.memory_space<smem>>
    %40 = arith.index_cast %39 : i32 to index
    %c0_48 = arith.constant 0 : index
    %c0_49 = arith.constant 0 : index
    %41 = vector.load %arg2[%40, %c0_48, %c0_49] : memref<50x1x128xf32, #tpu.memory_space<vmem>>, vector<1x1x128xf32>
    %42 = vector.shape_cast %41 : vector<1x1x128xf32> to vector<1x128xf32>
    %c1_50 = arith.constant 1 : index
    %c0_51 = arith.constant 0 : index
    %43 = vector.load %arg7[%c1_50, %c0_51] : memref<2x128xf32, #tpu.memory_space<vmem>>, vector<1x128xf32>
    tpu.vector_store %arg7[%c1_50, %c0_51], %42 {strides = array<i32>} : memref<2x128xf32, #tpu.memory_space<vmem>>, vector<1x128xf32>,
    %c0_52 = arith.constant 0 : index
    %c0_53 = arith.constant 0 : index
    %44 = vector.load %arg7[%c0_52, %c0_53] : memref<2x128xf32, #tpu.memory_space<vmem>>, vector<2x128xf32>
    %c0_54 = arith.constant 0 : index
    %c4 = arith.constant 4 : index
    %45 = memref.load %arg1[%c0_54, %c4] : memref<2x8xi32, #tpu.memory_space<smem>>
    %46 = arith.index_cast %45 : i32 to index
    %c0_55 = arith.constant 0 : index
    %c0_56 = arith.constant 0 : index
    %47 = vector.load %arg2[%46, %c0_55, %c0_56] : memref<50x1x128xf32, #tpu.memory_space<vmem>>, vector<1x1x128xf32>
    %48 = vector.shape_cast %47 : vector<1x1x128xf32> to vector<1x128xf32>
    %c0_57 = arith.constant 0 : index
    %c0_58 = arith.constant 0 : index
    %49 = vector.load %arg7[%c0_57, %c0_58] : memref<2x128xf32, #tpu.memory_space<vmem>>, vector<1x128xf32>
    tpu.vector_store %arg7[%c0_57, %c0_58], %48 {strides = array<i32>} : memref<2x128xf32, #tpu.memory_space<vmem>>, vector<1x128xf32>,
    %c1_59 = arith.constant 1 : index
    %c4_60 = arith.constant 4 : index
    %50 = memref.load %arg1[%c1_59, %c4_60] : memref<2x8xi32, #tpu.memory_space<smem>>
    %51 = arith.index_cast %50 : i32 to index
    %c0_61 = arith.constant 0 : index
    %c0_62 = arith.constant 0 : index
    %52 = vector.load %arg2[%51, %c0_61, %c0_62] : memref<50x1x128xf32, #tpu.memory_space<vmem>>, vector<1x1x128xf32>
    %53 = vector.shape_cast %52 : vector<1x1x128xf32> to vector<1x128xf32>
    %c1_63 = arith.constant 1 : index
    %c0_64 = arith.constant 0 : index
    %54 = vector.load %arg7[%c1_63, %c0_64] : memref<2x128xf32, #tpu.memory_space<vmem>>, vector<1x128xf32>
    tpu.vector_store %arg7[%c1_63, %c0_64], %53 {strides = array<i32>} : memref<2x128xf32, #tpu.memory_space<vmem>>, vector<1x128xf32>,
    %c0_65 = arith.constant 0 : index
    %c0_66 = arith.constant 0 : index
    %55 = vector.load %arg7[%c0_65, %c0_66] : memref<2x128xf32, #tpu.memory_space<vmem>>, vector<2x128xf32>
    %c0_67 = arith.constant 0 : index
    %c5 = arith.constant 5 : index
    %56 = memref.load %arg1[%c0_67, %c5] : memref<2x8xi32, #tpu.memory_space<smem>>
    %57 = arith.index_cast %56 : i32 to index
    %c0_68 = arith.constant 0 : index
    %c0_69 = arith.constant 0 : index
    %58 = vector.load %arg2[%57, %c0_68, %c0_69] : memref<50x1x128xf32, #tpu.memory_space<vmem>>, vector<1x1x128xf32>
    %59 = vector.shape_cast %58 : vector<1x1x128xf32> to vector<1x128xf32>
    %c0_70 = arith.constant 0 : index
    %c0_71 = arith.constant 0 : index
    %60 = vector.load %arg7[%c0_70, %c0_71] : memref<2x128xf32, #tpu.memory_space<vmem>>, vector<1x128xf32>
    tpu.vector_store %arg7[%c0_70, %c0_71], %59 {strides = array<i32>} : memref<2x128xf32, #tpu.memory_space<vmem>>, vector<1x128xf32>,
    %c1_72 = arith.constant 1 : index
    %c5_73 = arith.constant 5 : index
    %61 = memref.load %arg1[%c1_72, %c5_73] : memref<2x8xi32, #tpu.memory_space<smem>>
    %62 = arith.index_cast %61 : i32 to index
    %c0_74 = arith.constant 0 : index
    %c0_75 = arith.constant 0 : index
    %63 = vector.load %arg2[%62, %c0_74, %c0_75] : memref<50x1x128xf32, #tpu.memory_space<vmem>>, vector<1x1x128xf32>
    %64 = vector.shape_cast %63 : vector<1x1x128xf32> to vector<1x128xf32>
    %c1_76 = arith.constant 1 : index
    %c0_77 = arith.constant 0 : index
    %65 = vector.load %arg7[%c1_76, %c0_77] : memref<2x128xf32, #tpu.memory_space<vmem>>, vector<1x128xf32>
    tpu.vector_store %arg7[%c1_76, %c0_77], %64 {strides = array<i32>} : memref<2x128xf32, #tpu.memory_space<vmem>>, vector<1x128xf32>,
    %c0_78 = arith.constant 0 : index
    %c0_79 = arith.constant 0 : index
    %66 = vector.load %arg7[%c0_78, %c0_79] : memref<2x128xf32, #tpu.memory_space<vmem>>, vector<2x128xf32>
    %c0_80 = arith.constant 0 : index
    %c6 = arith.constant 6 : index
    %67 = memref.load %arg1[%c0_80, %c6] : memref<2x8xi32, #tpu.memory_space<smem>>
    %68 = arith.index_cast %67 : i32 to index
    %c0_81 = arith.constant 0 : index
    %c0_82 = arith.constant 0 : index
    %69 = vector.load %arg2[%68, %c0_81, %c0_82] : memref<50x1x128xf32, #tpu.memory_space<vmem>>, vector<1x1x128xf32>
    %70 = vector.shape_cast %69 : vector<1x1x128xf32> to vector<1x128xf32>
    %c0_83 = arith.constant 0 : index
    %c0_84 = arith.constant 0 : index
    %71 = vector.load %arg7[%c0_83, %c0_84] : memref<2x128xf32, #tpu.memory_space<vmem>>, vector<1x128xf32>
    tpu.vector_store %arg7[%c0_83, %c0_84], %70 {strides = array<i32>} : memref<2x128xf32, #tpu.memory_space<vmem>>, vector<1x128xf32>,
    %c1_85 = arith.constant 1 : index
    %c6_86 = arith.constant 6 : index
    %72 = memref.load %arg1[%c1_85, %c6_86] : memref<2x8xi32, #tpu.memory_space<smem>>
    %73 = arith.index_cast %72 : i32 to index
    %c0_87 = arith.constant 0 : index
    %c0_88 = arith.constant 0 : index
    %74 = vector.load %arg2[%73, %c0_87, %c0_88] : memref<50x1x128xf32, #tpu.memory_space<vmem>>, vector<1x1x128xf32>
    %75 = vector.shape_cast %74 : vector<1x1x128xf32> to vector<1x128xf32>
    %c1_89 = arith.constant 1 : index
    %c0_90 = arith.constant 0 : index
    %76 = vector.load %arg7[%c1_89, %c0_90] : memref<2x128xf32, #tpu.memory_space<vmem>>, vector<1x128xf32>
    tpu.vector_store %arg7[%c1_89, %c0_90], %75 {strides = array<i32>} : memref<2x128xf32, #tpu.memory_space<vmem>>, vector<1x128xf32>,
    %c0_91 = arith.constant 0 : index
    %c0_92 = arith.constant 0 : index
    %77 = vector.load %arg7[%c0_91, %c0_92] : memref<2x128xf32, #tpu.memory_space<vmem>>, vector<2x128xf32>
    %c0_93 = arith.constant 0 : index
    %c7 = arith.constant 7 : index
    %78 = memref.load %arg1[%c0_93, %c7] : memref<2x8xi32, #tpu.memory_space<smem>>
    %79 = arith.index_cast %78 : i32 to index
    %c0_94 = arith.constant 0 : index
    %c0_95 = arith.constant 0 : index
    %80 = vector.load %arg2[%79, %c0_94, %c0_95] : memref<50x1x128xf32, #tpu.memory_space<vmem>>, vector<1x1x128xf32>
    %81 = vector.shape_cast %80 : vector<1x1x128xf32> to vector<1x128xf32>
    %c0_96 = arith.constant 0 : index
    %c0_97 = arith.constant 0 : index
    %82 = vector.load %arg7[%c0_96, %c0_97] : memref<2x128xf32, #tpu.memory_space<vmem>>, vector<1x128xf32>
    tpu.vector_store %arg7[%c0_96, %c0_97], %81 {strides = array<i32>} : memref<2x128xf32, #tpu.memory_space<vmem>>, vector<1x128xf32>,
    %c1_98 = arith.constant 1 : index
    %c7_99 = arith.constant 7 : index
    %83 = memref.load %arg1[%c1_98, %c7_99] : memref<2x8xi32, #tpu.memory_space<smem>>
    %84 = arith.index_cast %83 : i32 to index
    %c0_100 = arith.constant 0 : index
    %c0_101 = arith.constant 0 : index
    %85 = vector.load %arg2[%84, %c0_100, %c0_101] : memref<50x1x128xf32, #tpu.memory_space<vmem>>, vector<1x1x128xf32>
    %86 = vector.shape_cast %85 : vector<1x1x128xf32> to vector<1x128xf32>
    %c1_102 = arith.constant 1 : index
    %c0_103 = arith.constant 0 : index
    %87 = vector.load %arg7[%c1_102, %c0_103] : memref<2x128xf32, #tpu.memory_space<vmem>>, vector<1x128xf32>
    tpu.vector_store %arg7[%c1_102, %c0_103], %86 {strides = array<i32>} : memref<2x128xf32, #tpu.memory_space<vmem>>, vector<1x128xf32>,
    %c0_104 = arith.constant 0 : index
    %c0_105 = arith.constant 0 : index
    %88 = vector.load %arg7[%c0_104, %c0_105] : memref<2x128xf32, #tpu.memory_space<vmem>>, vector<2x128xf32>
    %cst = arith.constant 0.000000e+00 : f32
    %89 = vector.broadcast %cst : f32 to vector<2x32xf32>
    %cst_106 = arith.constant 0.000000e+00 : f32
    %90 = vector.broadcast %cst_106 : f32 to vector<2x32xf32>
    %cst_107 = arith.constant dense<0.000000e+00> : vector<2x128xf32>
    %91 = tpu.matmul %89, %0, %cst_107 {dimension_numbers = #tpu.dot_dimension_numbers<[1], [0], [0], [1], [0, 0, 1, 1], [], []>} : vector<2x32xf32>, vector<32x128xf32>, vector<2x128xf32> -> vector<2x128xf32>
    %92 = arith.addf %11, %91 : vector<2x128xf32>
    %93 = vector.extract_strided_slice %92 {offsets = [0, 0], sizes = [2, 32], strides = [1, 1]} : vector<2x128xf32> to vector<2x32xf32>
    %94 = arith.negf %93 : vector<2x32xf32>
    %95 = math.exp %94 : vector<2x32xf32>
    %cst_108 = arith.constant 1.000000e+00 : f32
    %96 = vector.broadcast %cst_108 : f32 to vector<2x32xf32>
    %97 = arith.addf %96, %95 : vector<2x32xf32>
    %98 = arith.divf %96, %97 : vector<2x32xf32>
    %99 = vector.extract_strided_slice %92 {offsets = [0, 32], sizes = [2, 32], strides = [1, 1]} : vector<2x128xf32> to vector<2x32xf32>
    %100 = arith.negf %99 : vector<2x32xf32>
    %101 = math.exp %100 : vector<2x32xf32>
    %cst_109 = arith.constant 1.000000e+00 : f32
    %102 = vector.broadcast %cst_109 : f32 to vector<2x32xf32>
    %103 = arith.addf %102, %101 : vector<2x32xf32>
    %104 = arith.divf %102, %103 : vector<2x32xf32>
    %105 = vector.extract_strided_slice %92 {offsets = [0, 64], sizes = [2, 32], strides = [1, 1]} : vector<2x128xf32> to vector<2x32xf32>
    %106 = math.tanh %105 : vector<2x32xf32>
    %107 = vector.extract_strided_slice %92 {offsets = [0, 96], sizes = [2, 32], strides = [1, 1]} : vector<2x128xf32> to vector<2x32xf32>
    %108 = arith.negf %107 : vector<2x32xf32>
    %109 = math.exp %108 : vector<2x32xf32>
    %cst_110 = arith.constant 1.000000e+00 : f32
    %110 = vector.broadcast %cst_110 : f32 to vector<2x32xf32>
    %111 = arith.addf %110, %109 : vector<2x32xf32>
    %112 = arith.divf %110, %111 : vector<2x32xf32>
    %113 = arith.mulf %104, %90 : vector<2x32xf32>
    %114 = arith.mulf %98, %106 : vector<2x32xf32>
    %115 = arith.addf %113, %114 : vector<2x32xf32>
    %116 = math.tanh %115 : vector<2x32xf32>
    %117 = arith.mulf %112, %116 : vector<2x32xf32>
    %cst_111 = arith.constant dense<0.000000e+00> : vector<2x128xf32>
    %118 = tpu.matmul %117, %0, %cst_111 {dimension_numbers = #tpu.dot_dimension_numbers<[1], [0], [0], [1], [0, 0, 1, 1], [], []>} : vector<2x32xf32>, vector<32x128xf32>, vector<2x128xf32> -> vector<2x128xf32>
    %119 = arith.addf %22, %118 : vector<2x128xf32>
    %120 = vector.extract_strided_slice %119 {offsets = [0, 0], sizes = [2, 32], strides = [1, 1]} : vector<2x128xf32> to vector<2x32xf32>
    %121 = arith.negf %120 : vector<2x32xf32>
    %122 = math.exp %121 : vector<2x32xf32>
    %cst_112 = arith.constant 1.000000e+00 : f32
    %123 = vector.broadcast %cst_112 : f32 to vector<2x32xf32>
    %124 = arith.addf %123, %122 : vector<2x32xf32>
    %125 = arith.divf %123, %124 : vector<2x32xf32>
    %126 = vector.extract_strided_slice %119 {offsets = [0, 32], sizes = [2, 32], strides = [1, 1]} : vector<2x128xf32> to vector<2x32xf32>
    %127 = arith.negf %126 : vector<2x32xf32>
    %128 = math.exp %127 : vector<2x32xf32>
    %cst_113 = arith.constant 1.000000e+00 : f32
    %129 = vector.broadcast %cst_113 : f32 to vector<2x32xf32>
    %130 = arith.addf %129, %128 : vector<2x32xf32>
    %131 = arith.divf %129, %130 : vector<2x32xf32>
    %132 = vector.extract_strided_slice %119 {offsets = [0, 64], sizes = [2, 32], strides = [1, 1]} : vector<2x128xf32> to vector<2x32xf32>
    %133 = math.tanh %132 : vector<2x32xf32>
    %134 = vector.extract_strided_slice %119 {offsets = [0, 96], sizes = [2, 32], strides = [1, 1]} : vector<2x128xf32> to vector<2x32xf32>
    %135 = arith.negf %134 : vector<2x32xf32>
    %136 = math.exp %135 : vector<2x32xf32>
    %cst_114 = arith.constant 1.000000e+00 : f32
    %137 = vector.broadcast %cst_114 : f32 to vector<2x32xf32>
    %138 = arith.addf %137, %136 : vector<2x32xf32>
    %139 = arith.divf %137, %138 : vector<2x32xf32>
    %140 = arith.mulf %131, %115 : vector<2x32xf32>
    %141 = arith.mulf %125, %133 : vector<2x32xf32>
    %142 = arith.addf %140, %141 : vector<2x32xf32>
    %143 = math.tanh %142 : vector<2x32xf32>
    %144 = arith.mulf %139, %143 : vector<2x32xf32>
    %cst_115 = arith.constant dense<0.000000e+00> : vector<2x128xf32>
    %145 = tpu.matmul %144, %0, %cst_115 {dimension_numbers = #tpu.dot_dimension_numbers<[1], [0], [0], [1], [0, 0, 1, 1], [], []>} : vector<2x32xf32>, vector<32x128xf32>, vector<2x128xf32> -> vector<2x128xf32>
    %146 = arith.addf %33, %145 : vector<2x128xf32>
    %147 = vector.extract_strided_slice %146 {offsets = [0, 0], sizes = [2, 32], strides = [1, 1]} : vector<2x128xf32> to vector<2x32xf32>
    %148 = arith.negf %147 : vector<2x32xf32>
    %149 = math.exp %148 : vector<2x32xf32>
    %cst_116 = arith.constant 1.000000e+00 : f32
    %150 = vector.broadcast %cst_116 : f32 to vector<2x32xf32>
    %151 = arith.addf %150, %149 : vector<2x32xf32>
    %152 = arith.divf %150, %151 : vector<2x32xf32>
    %153 = vector.extract_strided_slice %146 {offsets = [0, 32], sizes = [2, 32], strides = [1, 1]} : vector<2x128xf32> to vector<2x32xf32>
    %154 = arith.negf %153 : vector<2x32xf32>
    %155 = math.exp %154 : vector<2x32xf32>
    %cst_117 = arith.constant 1.000000e+00 : f32
    %156 = vector.broadcast %cst_117 : f32 to vector<2x32xf32>
    %157 = arith.addf %156, %155 : vector<2x32xf32>
    %158 = arith.divf %156, %157 : vector<2x32xf32>
    %159 = vector.extract_strided_slice %146 {offsets = [0, 64], sizes = [2, 32], strides = [1, 1]} : vector<2x128xf32> to vector<2x32xf32>
    %160 = math.tanh %159 : vector<2x32xf32>
    %161 = vector.extract_strided_slice %146 {offsets = [0, 96], sizes = [2, 32], strides = [1, 1]} : vector<2x128xf32> to vector<2x32xf32>
    %162 = arith.negf %161 : vector<2x32xf32>
    %163 = math.exp %162 : vector<2x32xf32>
    %cst_118 = arith.constant 1.000000e+00 : f32
    %164 = vector.broadcast %cst_118 : f32 to vector<2x32xf32>
    %165 = arith.addf %164, %163 : vector<2x32xf32>
    %166 = arith.divf %164, %165 : vector<2x32xf32>
    %167 = arith.mulf %158, %142 : vector<2x32xf32>
    %168 = arith.mulf %152, %160 : vector<2x32xf32>
    %169 = arith.addf %167, %168 : vector<2x32xf32>
    %170 = math.tanh %169 : vector<2x32xf32>
    %171 = arith.mulf %166, %170 : vector<2x32xf32>
    %cst_119 = arith.constant dense<0.000000e+00> : vector<2x128xf32>
    %172 = tpu.matmul %171, %0, %cst_119 {dimension_numbers = #tpu.dot_dimension_numbers<[1], [0], [0], [1], [0, 0, 1, 1], [], []>} : vector<2x32xf32>, vector<32x128xf32>, vector<2x128xf32> -> vector<2x128xf32>
    %173 = arith.addf %44, %172 : vector<2x128xf32>
    %174 = vector.extract_strided_slice %173 {offsets = [0, 0], sizes = [2, 32], strides = [1, 1]} : vector<2x128xf32> to vector<2x32xf32>
    %175 = arith.negf %174 : vector<2x32xf32>
    %176 = math.exp %175 : vector<2x32xf32>
    %cst_120 = arith.constant 1.000000e+00 : f32
    %177 = vector.broadcast %cst_120 : f32 to vector<2x32xf32>
    %178 = arith.addf %177, %176 : vector<2x32xf32>
    %179 = arith.divf %177, %178 : vector<2x32xf32>
    %180 = vector.extract_strided_slice %173 {offsets = [0, 32], sizes = [2, 32], strides = [1, 1]} : vector<2x128xf32> to vector<2x32xf32>
    %181 = arith.negf %180 : vector<2x32xf32>
    %182 = math.exp %181 : vector<2x32xf32>
    %cst_121 = arith.constant 1.000000e+00 : f32
    %183 = vector.broadcast %cst_121 : f32 to vector<2x32xf32>
    %184 = arith.addf %183, %182 : vector<2x32xf32>
    %185 = arith.divf %183, %184 : vector<2x32xf32>
    %186 = vector.extract_strided_slice %173 {offsets = [0, 64], sizes = [2, 32], strides = [1, 1]} : vector<2x128xf32> to vector<2x32xf32>
    %187 = math.tanh %186 : vector<2x32xf32>
    %188 = vector.extract_strided_slice %173 {offsets = [0, 96], sizes = [2, 32], strides = [1, 1]} : vector<2x128xf32> to vector<2x32xf32>
    %189 = arith.negf %188 : vector<2x32xf32>
    %190 = math.exp %189 : vector<2x32xf32>
    %cst_122 = arith.constant 1.000000e+00 : f32
    %191 = vector.broadcast %cst_122 : f32 to vector<2x32xf32>
    %192 = arith.addf %191, %190 : vector<2x32xf32>
    %193 = arith.divf %191, %192 : vector<2x32xf32>
    %194 = arith.mulf %185, %169 : vector<2x32xf32>
    %195 = arith.mulf %179, %187 : vector<2x32xf32>
    %196 = arith.addf %194, %195 : vector<2x32xf32>
    %197 = math.tanh %196 : vector<2x32xf32>
    %198 = arith.mulf %193, %197 : vector<2x32xf32>
    %cst_123 = arith.constant dense<0.000000e+00> : vector<2x128xf32>
    %199 = tpu.matmul %198, %0, %cst_123 {dimension_numbers = #tpu.dot_dimension_numbers<[1], [0], [0], [1], [0, 0, 1, 1], [], []>} : vector<2x32xf32>, vector<32x128xf32>, vector<2x128xf32> -> vector<2x128xf32>
    %200 = arith.addf %55, %199 : vector<2x128xf32>
    %201 = vector.extract_strided_slice %200 {offsets = [0, 0], sizes = [2, 32], strides = [1, 1]} : vector<2x128xf32> to vector<2x32xf32>
    %202 = arith.negf %201 : vector<2x32xf32>
    %203 = math.exp %202 : vector<2x32xf32>
    %cst_124 = arith.constant 1.000000e+00 : f32
    %204 = vector.broadcast %cst_124 : f32 to vector<2x32xf32>
    %205 = arith.addf %204, %203 : vector<2x32xf32>
    %206 = arith.divf %204, %205 : vector<2x32xf32>
    %207 = vector.extract_strided_slice %200 {offsets = [0, 32], sizes = [2, 32], strides = [1, 1]} : vector<2x128xf32> to vector<2x32xf32>
    %208 = arith.negf %207 : vector<2x32xf32>
    %209 = math.exp %208 : vector<2x32xf32>
    %cst_125 = arith.constant 1.000000e+00 : f32
    %210 = vector.broadcast %cst_125 : f32 to vector<2x32xf32>
    %211 = arith.addf %210, %209 : vector<2x32xf32>
    %212 = arith.divf %210, %211 : vector<2x32xf32>
    %213 = vector.extract_strided_slice %200 {offsets = [0, 64], sizes = [2, 32], strides = [1, 1]} : vector<2x128xf32> to vector<2x32xf32>
    %214 = math.tanh %213 : vector<2x32xf32>
    %215 = vector.extract_strided_slice %200 {offsets = [0, 96], sizes = [2, 32], strides = [1, 1]} : vector<2x128xf32> to vector<2x32xf32>
    %216 = arith.negf %215 : vector<2x32xf32>
    %217 = math.exp %216 : vector<2x32xf32>
    %cst_126 = arith.constant 1.000000e+00 : f32
    %218 = vector.broadcast %cst_126 : f32 to vector<2x32xf32>
    %219 = arith.addf %218, %217 : vector<2x32xf32>
    %220 = arith.divf %218, %219 : vector<2x32xf32>
    %221 = arith.mulf %212, %196 : vector<2x32xf32>
    %222 = arith.mulf %206, %214 : vector<2x32xf32>
    %223 = arith.addf %221, %222 : vector<2x32xf32>
    %224 = math.tanh %223 : vector<2x32xf32>
    %225 = arith.mulf %220, %224 : vector<2x32xf32>
    %cst_127 = arith.constant dense<0.000000e+00> : vector<2x128xf32>
    %226 = tpu.matmul %225, %0, %cst_127 {dimension_numbers = #tpu.dot_dimension_numbers<[1], [0], [0], [1], [0, 0, 1, 1], [], []>} : vector<2x32xf32>, vector<32x128xf32>, vector<2x128xf32> -> vector<2x128xf32>
    %227 = arith.addf %66, %226 : vector<2x128xf32>
    %228 = vector.extract_strided_slice %227 {offsets = [0, 0], sizes = [2, 32], strides = [1, 1]} : vector<2x128xf32> to vector<2x32xf32>
    %229 = arith.negf %228 : vector<2x32xf32>
    %230 = math.exp %229 : vector<2x32xf32>
    %cst_128 = arith.constant 1.000000e+00 : f32
    %231 = vector.broadcast %cst_128 : f32 to vector<2x32xf32>
    %232 = arith.addf %231, %230 : vector<2x32xf32>
    %233 = arith.divf %231, %232 : vector<2x32xf32>
    %234 = vector.extract_strided_slice %227 {offsets = [0, 32], sizes = [2, 32], strides = [1, 1]} : vector<2x128xf32> to vector<2x32xf32>
    %235 = arith.negf %234 : vector<2x32xf32>
    %236 = math.exp %235 : vector<2x32xf32>
    %cst_129 = arith.constant 1.000000e+00 : f32
    %237 = vector.broadcast %cst_129 : f32 to vector<2x32xf32>
    %238 = arith.addf %237, %236 : vector<2x32xf32>
    %239 = arith.divf %237, %238 : vector<2x32xf32>
    %240 = vector.extract_strided_slice %227 {offsets = [0, 64], sizes = [2, 32], strides = [1, 1]} : vector<2x128xf32> to vector<2x32xf32>
    %241 = math.tanh %240 : vector<2x32xf32>
    %242 = vector.extract_strided_slice %227 {offsets = [0, 96], sizes = [2, 32], strides = [1, 1]} : vector<2x128xf32> to vector<2x32xf32>
    %243 = arith.negf %242 : vector<2x32xf32>
    %244 = math.exp %243 : vector<2x32xf32>
    %cst_130 = arith.constant 1.000000e+00 : f32
    %245 = vector.broadcast %cst_130 : f32 to vector<2x32xf32>
    %246 = arith.addf %245, %244 : vector<2x32xf32>
    %247 = arith.divf %245, %246 : vector<2x32xf32>
    %248 = arith.mulf %239, %223 : vector<2x32xf32>
    %249 = arith.mulf %233, %241 : vector<2x32xf32>
    %250 = arith.addf %248, %249 : vector<2x32xf32>
    %251 = math.tanh %250 : vector<2x32xf32>
    %252 = arith.mulf %247, %251 : vector<2x32xf32>
    %cst_131 = arith.constant dense<0.000000e+00> : vector<2x128xf32>
    %253 = tpu.matmul %252, %0, %cst_131 {dimension_numbers = #tpu.dot_dimension_numbers<[1], [0], [0], [1], [0, 0, 1, 1], [], []>} : vector<2x32xf32>, vector<32x128xf32>, vector<2x128xf32> -> vector<2x128xf32>
    %254 = arith.addf %77, %253 : vector<2x128xf32>
    %255 = vector.extract_strided_slice %254 {offsets = [0, 0], sizes = [2, 32], strides = [1, 1]} : vector<2x128xf32> to vector<2x32xf32>
    %256 = arith.negf %255 : vector<2x32xf32>
    %257 = math.exp %256 : vector<2x32xf32>
    %cst_132 = arith.constant 1.000000e+00 : f32
    %258 = vector.broadcast %cst_132 : f32 to vector<2x32xf32>
    %259 = arith.addf %258, %257 : vector<2x32xf32>
    %260 = arith.divf %258, %259 : vector<2x32xf32>
    %261 = vector.extract_strided_slice %254 {offsets = [0, 32], sizes = [2, 32], strides = [1, 1]} : vector<2x128xf32> to vector<2x32xf32>
    %262 = arith.negf %261 : vector<2x32xf32>
    %263 = math.exp %262 : vector<2x32xf32>
    %cst_133 = arith.constant 1.000000e+00 : f32
    %264 = vector.broadcast %cst_133 : f32 to vector<2x32xf32>
    %265 = arith.addf %264, %263 : vector<2x32xf32>
    %266 = arith.divf %264, %265 : vector<2x32xf32>
    %267 = vector.extract_strided_slice %254 {offsets = [0, 64], sizes = [2, 32], strides = [1, 1]} : vector<2x128xf32> to vector<2x32xf32>
    %268 = math.tanh %267 : vector<2x32xf32>
    %269 = vector.extract_strided_slice %254 {offsets = [0, 96], sizes = [2, 32], strides = [1, 1]} : vector<2x128xf32> to vector<2x32xf32>
    %270 = arith.negf %269 : vector<2x32xf32>
    %271 = math.exp %270 : vector<2x32xf32>
    %cst_134 = arith.constant 1.000000e+00 : f32
    %272 = vector.broadcast %cst_134 : f32 to vector<2x32xf32>
    %273 = arith.addf %272, %271 : vector<2x32xf32>
    %274 = arith.divf %272, %273 : vector<2x32xf32>
    %275 = arith.mulf %266, %250 : vector<2x32xf32>
    %276 = arith.mulf %260, %268 : vector<2x32xf32>
    %277 = arith.addf %275, %276 : vector<2x32xf32>
    %278 = math.tanh %277 : vector<2x32xf32>
    %279 = arith.mulf %274, %278 : vector<2x32xf32>
    %cst_135 = arith.constant dense<0.000000e+00> : vector<2x128xf32>
    %280 = tpu.matmul %279, %0, %cst_135 {dimension_numbers = #tpu.dot_dimension_numbers<[1], [0], [0], [1], [0, 0, 1, 1], [], []>} : vector<2x32xf32>, vector<32x128xf32>, vector<2x128xf32> -> vector<2x128xf32>
    %281 = arith.addf %88, %280 : vector<2x128xf32>
    %282 = vector.extract_strided_slice %281 {offsets = [0, 0], sizes = [2, 32], strides = [1, 1]} : vector<2x128xf32> to vector<2x32xf32>
    %283 = arith.negf %282 : vector<2x32xf32>
    %284 = math.exp %283 : vector<2x32xf32>
    %cst_136 = arith.constant 1.000000e+00 : f32
    %285 = vector.broadcast %cst_136 : f32 to vector<2x32xf32>
    %286 = arith.addf %285, %284 : vector<2x32xf32>
    %287 = arith.divf %285, %286 : vector<2x32xf32>
    %288 = vector.extract_strided_slice %281 {offsets = [0, 32], sizes = [2, 32], strides = [1, 1]} : vector<2x128xf32> to vector<2x32xf32>
    %289 = arith.negf %288 : vector<2x32xf32>
    %290 = math.exp %289 : vector<2x32xf32>
    %cst_137 = arith.constant 1.000000e+00 : f32
    %291 = vector.broadcast %cst_137 : f32 to vector<2x32xf32>
    %292 = arith.addf %291, %290 : vector<2x32xf32>
    %293 = arith.divf %291, %292 : vector<2x32xf32>
    %294 = vector.extract_strided_slice %281 {offsets = [0, 64], sizes = [2, 32], strides = [1, 1]} : vector<2x128xf32> to vector<2x32xf32>
    %295 = math.tanh %294 : vector<2x32xf32>
    %296 = vector.extract_strided_slice %281 {offsets = [0, 96], sizes = [2, 32], strides = [1, 1]} : vector<2x128xf32> to vector<2x32xf32>
    %297 = arith.negf %296 : vector<2x32xf32>
    %298 = math.exp %297 : vector<2x32xf32>
    %cst_138 = arith.constant 1.000000e+00 : f32
    %299 = vector.broadcast %cst_138 : f32 to vector<2x32xf32>
    %300 = arith.addf %299, %298 : vector<2x32xf32>
    %301 = arith.divf %299, %300 : vector<2x32xf32>
    %302 = arith.mulf %293, %277 : vector<2x32xf32>
    %303 = arith.mulf %287, %295 : vector<2x32xf32>
    %304 = arith.addf %302, %303 : vector<2x32xf32>
    %305 = math.tanh %304 : vector<2x32xf32>
    %306 = arith.mulf %301, %305 : vector<2x32xf32>
    %c0_139 = arith.constant 0 : index
    %c0_140 = arith.constant 0 : index
    %307 = vector.load %arg4[%c0_139, %c0_140] : memref<32x12xf32, #tpu.memory_space<vmem>>, vector<32x12xf32>
    %cst_141 = arith.constant dense<0.000000e+00> : vector<2x12xf32>
    %308 = tpu.matmul %306, %307, %cst_141 {dimension_numbers = #tpu.dot_dimension_numbers<[1], [0], [0], [1], [0, 0, 1, 1], [], []>} : vector<2x32xf32>, vector<32x12xf32>, vector<2x12xf32> -> vector<2x12xf32>
    %c0_142 = arith.constant 0 : index
    %c0_143 = arith.constant 0 : index
    %309 = vector.load %arg5[%c0_142, %c0_143] : memref<1x12xf32, #tpu.memory_space<vmem>>, vector<1x12xf32>
    %310 = vector.broadcast %309 : vector<1x12xf32> to vector<2x12xf32>
    %311 = arith.addf %308, %310 : vector<2x12xf32>
    %c0_144 = arith.constant 0 : index
    %c0_145 = arith.constant 0 : index
    %312 = vector.load %arg6[%c0_144, %c0_145] : memref<2x12xf32, #tpu.memory_space<vmem>>, vector<2x12xf32>
    tpu.vector_store %arg6[%c0_144, %c0_145], %311 {strides = array<i32>} : memref<2x12xf32, #tpu.memory_space<vmem>>, vector<2x12xf32>,
    return
  }
  func.func @transform_0(%arg0: i32, %arg1: memref<2x8xi32, #tpu.memory_space<smem>>) -> (i32, i32, i32) {
    %c0_i32 = arith.constant 0 : i32
    %c0_i32_0 = arith.constant 0 : i32
    %c0_i32_1 = arith.constant 0 : i32
    %c0_i32_2 = arith.constant 0 : i32
    return %c0_i32, %c0_i32_0, %c0_i32_1 : i32, i32, i32
  }
  func.func @transform_1(%arg0: i32, %arg1: memref<2x8xi32, #tpu.memory_space<smem>>) -> (i32, i32) {
    %c0_i32 = arith.constant 0 : i32
    %c0_i32_0 = arith.constant 0 : i32
    %c0_i32_1 = arith.constant 0 : i32
    return %c0_i32, %c0_i32_0 : i32, i32
  }
  func.func @transform_2(%arg0: i32, %arg1: memref<2x8xi32, #tpu.memory_space<smem>>) -> (i32, i32) {
    %c0_i32 = arith.constant 0 : i32
    %c0_i32_0 = arith.constant 0 : i32
    %c0_i32_1 = arith.constant 0 : i32
    return %c0_i32, %c0_i32_0 : i32, i32
  }
  func.func @transform_3(%arg0: i32, %arg1: memref<2x8xi32, #tpu.memory_space<smem>>) -> (i32, i32) {
    %c0_i32 = arith.constant 0 : i32
    %c0_i32_0 = arith.constant 0 : i32
    %c0_i32_1 = arith.constant 0 : i32
    return %c0_i32, %c0_i32_0 : i32, i32
  }
  func.func @transform_4(%arg0: i32, %arg1: memref<2x8xi32, #tpu.memory_space<smem>>) -> (i32, i32) {
    %c0_i32 = arith.constant 0 : i32
    %c0_i32_0 = arith.constant 0 : i32
    %c0_i32_1 = arith.constant 0 : i32
    return %c0_i32, %c0_i32_0 : i32, i32
  }
}

</mosaic_0001>

<bundles_post_ra>
// kernel: pmodel_forward.1
= control target key start
LH: loop header
LB: loop body
LE: loop exit
PB: predicated region body
PF: predicated region fallthrough
CT: control target
= control target key end

     0   :  { %s1631_s0 = inlined_call_operand.hbm [shape: s32[2,8], index: 0, kind: input, shape index: {}]   ;;  %s1632_s1 = inlined_call_operand.vmem [shape: f32[50,1,128], index: 1, kind: input, shape index: {}]   ;;  %s1633_s2 = inlined_call_operand.hbm [shape: f32[32,128], index: 2, kind: input, shape index: {}]   ;;  %s1634_s3 = inlined_call_operand.vmem [shape: f32[32,12], index: 3, kind: input, shape index: {}]   ;;  %s1635_s4 = inlined_call_operand.vmem [shape: f32[1,12], index: 4, kind: input, shape index: {}]   ;;  %s1636_s5 = inlined_call_operand.hbm [shape: f32[2,12], index: 5, kind: output, shape index: {}]  }
   0x1   :  { %s1335_s20 = scalar_lea.hbm %s1631_s0, 32 }
   0x2   :  { %p1336_p0 = scmp.ne.s32.totalorder %s1631_s0, %s1335_s20  ;;  %p1339_p1 = scmp.lt.u32.totalorder %s1335_s20, %s1631_s0 }
   0x4   :  { %p1341_p2 = pnand %p1339_p1, %p1336_p0 }
   0x6   :  { %1344 = shalt.err (!%p1341_p2)  }
   0x7   :  { %s1395_s25 = smov [#allocation4]  }
   0x8   :  { %11 = dma.hbm_to_smem %s1631_s0, 32, %s1395_s25, [#allocation3] }
   0x9   :  { %1389 = dma.done.wait [#allocation3], 32 }
   0xa   :  { %1390 = vsyncadd [#allocation3], 4294967264 }
   0xb   :  { %13 = sfence }
   0xc   :  { %14 = vsyncpa [#allocation6], 0 }
   0xd   :  { %15 = vsyncpa [#allocation7], 0  ;;  %s1396_s28 = smov [#allocation5]   ;;  %s1345_s7 = scalar_lea.hbm %s1633_s2, 512 }
   0xe   :  { %s23_s29 = sshll.u32 %s1396_s28, 4  ;;  %p1346_p3 = scmp.ne.s32.totalorder %s1633_s2, %s1345_s7  ;;  %s24_s29 = int_to_ptr.vmem [resolvable:$true] %s23_s29 }
   0xf   :  { %p1349_p4 = scmp.lt.u32.totalorder %s1345_s7, %s1633_s2 }
  0x11   :  { %p1351_p5 = pnand %p1349_p4, %p1346_p3 }
  0x13   :  { %1354 = shalt.err (!%p1351_p5)
}
  0x14   :  { %s1355_s0 = scalar_lea.vmem %s24_s29, 512  ;;  %p1360_p7 = scmp.lt.s32.totalorder %s24_s29, %s24_s29 }
  0x15   :  { %p1356_p6 = scmp.ne.s32.totalorder %s24_s29, %s1355_s0  ;;  %p1361_p8 = scmp.lt.s32.totalorder %s1355_s0, %s1355_s0 }
  0x17   :  { %p1362_p9 = por %p1361_p8, %p1360_p7 }
  0x19   :  { %p1363_p10 = pnand %p1362_p9, %p1356_p6 }
  0x1b   :  { %1366 = shalt.err (!%p1363_p10)
}
  0x1c   :  { %s1397_s12 = smov 128   ;;  %s1398_s13 = smov 8  }
  0x1d   :  { %29 = dma.hbm_to_vmem [thread:$0]  %s1633_s2, 512, %s24_s29, [#allocation6], %s1397_s12, %s1397_s12, %s1398_s13  }
  0x1e   :  { %1391 = dma.done.wait [#allocation6], 512  }
  0x1f   :  { %1392 = vsyncadd [#allocation6], 4294966784  ;;  %v1399_v0 = vmov 0.0|0.0   ;;  %vm1400_vm0 = vmmov 0   ;;  %v1401_v1 = vmov 0.0   ;;  %s41_s16 = sld [smem:[#allocation4]] }
  0x20   :  { %1207 = vmatprep.subr.bf16.mxu0 %v1399_v0  ;;  %1116 = vmatprep.mubr.msk.f32.mxu0 %vm1400_vm0, %v1401_v1  ;;  %s1031_s17 = sld [smem:[#allocation4 + $0x80]]  ;;  %v37_v2 = vld [vmem:[#allocation5] sm:$0xff]  ;;  %v38_v3 = vld [vmem:[#allocation5 + $0x8] sm:$0xff]  ;;  %v39_v4 = vld [vmem:[#allocation5 + $0x10] sm:$0xff]  ;;  %s1402_s23 = smov 64   ;;  %vm113_vm1 = vcmask 261120  }
  0x21   :  { %1213 = vmatprep.subr.bf16.mxu1 %v1399_v0  ;;  %1127 = vmatprep.mubr.msk.f32.mxu1 %vm1400_vm0, %v1401_v1  ;;  %v1471_v5 = vpack.c.bf16 %v38_v3, %v37_v2  ;;  %v40_v6 = vld [vmem:[#allocation5 + $0x18] sm:$0xff]  ;;  %s1403_s24 = smov 32   ;;  %s1032_s25 = sld [smem:[#allocation4 + $0x1]]  ;;  %vm998_vm2 = vcmask 91136  }
  0x22   :  { %v1474_v9 = vpack.c.bf16 %v40_v6, %v39_v4  ;;  %s1033_s26 = sld [smem:[#allocation4 + $0x81]]  ;;  %s1034_s8 = sld [smem:[#allocation4 + $0x2]] }
  0x23   :  { %1209 = vmatpush3.bf16.msra.mxu0 %v1471_v5  ;;  %1215 = vmatpush3.bf16.msra.mxu1 %v1471_v5  ;;  %s1035_s9 = sld [smem:[#allocation4 + $0x82]]  ;;  %s1036_s15 = sld [smem:[#allocation4 + $0x3]] }
  0x24   :  { %1210 = vmatprep.subr.bf16.mxu0 %v1399_v0  ;;  %1216 = vmatprep.subr.bf16.mxu1 %v1399_v0  ;;  %s1039_s2 = sld [smem:[#allocation4 + $0x84]]  ;;  %s1044_s21 = sld [smem:[#allocation4 + $0x7]] }
  0x25   :  { %s42_s19 = scalar_lea.vmem %s1632_s1, %s41_s16  ;;  %s1037_s16 = sld [smem:[#allocation4 + $0x83]] }
  0x26   :  { %s46_s22 = scalar_lea.vmem %s1632_s1, %s1031_s17  ;;  %v43_v7 = vld [vmem:[%s42_s19] sm:$0x1]  ;;  %s1038_s17 = sld [smem:[#allocation4 + $0x4]] }
  0x27   :  { %v47_v8 = vld [vmem:[%s46_s22] sm:$0x1]  ;;  %44 = vst [vmem:[#allocation2] sm:$0x1] %v43_v7  ;;  %1212 = vmatpush3.bf16.msra.mxu0 %v1474_v9  ;;  %1218 = vmatpush3.bf16.msra.mxu1 %v1474_v9  ;;  %s51_s29 = scalar_lea.vmem %s1632_s1, %s1032_s25  ;;  %s1045_s22 = sld [smem:[#allocation4 + $0x87]] }
  0x28   :  { %48 = vst [vmem:[#allocation2 + $0x1] sm:$0x1] %v47_v8  ;;  %1219 = vmatprep.subr.bf16.mxu0 %v1399_v0  ;;  %1225 = vmatprep.subr.bf16.mxu1 %v1399_v0  ;;  %s55_s7 = scalar_lea.vmem %s1632_s1, %s1033_s26  ;;  %v52_v25 = vld [vmem:[%s51_s29] sm:$0x1]  ;;  %s60_s0 = scalar_lea.vmem %s1632_s1, %s1034_s8 }
  0x29   :  { %v56_v26 = vld [vmem:[%s55_s7] sm:$0x1]  ;;  %s64_s14 = scalar_lea.vmem %s1632_s1, %s1035_s9  ;;  %s69_s20 = scalar_lea.vmem %s1632_s1, %s1036_s15 }
  0x2a   :  { %1117 = vmatmul.mubr.f32.vlgmr.msra.gmra.mrb[0].mxu0 %v1401_v1  ;;  %v61_v45 = vld [vmem:[%s60_s0] sm:$0x1]  ;;  %s82_s6 = scalar_lea.vmem %s1632_s1, %s1039_s2  ;;  %s1040_s7 = sld [smem:[#allocation4 + $0x5]] }
  0x2b   :  { %1221 = vmatpush3.bf16.msra.mxu0 %v1471_v5  ;;  %1138 = vmatprep.mubr.msk.f32.mxu0 %vm1400_vm0, %v1401_v1  ;;  %v65_v46 = vld [vmem:[%s64_s14] sm:$0x1]  ;;  %s73_s25 = scalar_lea.vmem %s1632_s1, %s1037_s16  ;;  %s1041_s8 = sld [smem:[#allocation4 + $0x85]] }
  0x2c   :  { %1222 = vmatprep.subr.bf16.mxu0 %v1399_v0  ;;  %v70_v3 = vld [vmem:[%s69_s20] sm:$0x1]  ;;  %s78_s28 = scalar_lea.vmem %s1632_s1, %s1038_s17  ;;  %s1042_s14 = sld [smem:[#allocation4 + $0x6]] }
  0x2d   :  { %v74_v4 = vld [vmem:[%s73_s25] sm:$0x1]  ;;  %s1043_s15 = sld [smem:[#allocation4 + $0x86]]  ;;  %s105_s27 = scalar_lea.vmem %s1632_s1, %s1044_s21 }
  0x2e   :  { %v79_v8 = vld [vmem:[%s78_s28] sm:$0x1]  ;;  %s109_s30 = scalar_lea.vmem %s1632_s1, %s1045_s22 }
  0x2f   :  { %1224 = vmatpush3.bf16.msra.mxu0 %v1474_v9  ;;  %v49_v10 = vld [vmem:[#allocation2] sm:$0x3] }
  0x30   :  { %1231 = vmatprep.subr.bf16.mxu0 %v1399_v0  ;;  %53 = vst [vmem:[#allocation2] sm:$0x1] %v52_v25  ;;  %57 = vst [vmem:[#allocation2 + $0x1] sm:$0x1] %v56_v26  ;;  %s87_s11 = scalar_lea.vmem %s1632_s1, %s1040_s7 }
  0x31   :  { %s91_s13 = scalar_lea.vmem %s1632_s1, %s1041_s8 }
  0x32   :  { %s96_s2 = scalar_lea.vmem %s1632_s1, %s1042_s14 }
  0x33   :  { %s100_s20 = scalar_lea.vmem %s1632_s1, %s1043_s15 }
  0x37   :  { %v58_v30 = vld [vmem:[#allocation2] sm:$0x3] }
  0x38   :  { %62 = vst [vmem:[#allocation2] sm:$0x1] %v61_v45  ;;  %66 = vst [vmem:[#allocation2 + $0x1] sm:$0x1] %v65_v46 }
  0x3f   :  { %v67_v50 = vld [vmem:[#allocation2] sm:$0x3] }
  0x40   :  { %71 = vst [vmem:[#allocation2] sm:$0x1] %v70_v3  ;;  %75 = vst [vmem:[#allocation2 + $0x1] sm:$0x1] %v74_v4  ;;  %v106_v4 = vld [vmem:[%s105_s27] sm:$0x1] }
  0xfd   :  { %v183_v11 = vpop.f32.mrb[0].mxu0 }
  0xfe   :  { %v187_v12 = vadd.f32 %v183_v11, %v49_v10  ;;  %v1118_v13 = vpop.f32.mrb[1].mxu0  ;;  %v83_v10 = vld [vmem:[%s82_s6] sm:$0x1] }
  0xff   :  { %v76_v11 = vld [vmem:[#allocation2] sm:$0x3] }
 0x100   :  { %1271 = vtanh.f32 %v187_v12  ;;  %v1046_v15 = vmul.f32 -1.442695, %v187_v12  ;;  %80 = vst [vmem:[#allocation2] sm:$0x1] %v79_v8  ;;  %84 = vst [vmem:[#allocation2 + $0x1] sm:$0x1] %v83_v10 }
 0x102   :  { %1273 = vpow2.f32 %v1046_v15 }
 0x10a   :  { %v1272_v14 = vpop.eup %1271 }
 0x10b   :  { %197 = vrot.lane.b32.xlu0 %v1272_v14, %s1402_s23 }
 0x10c   :  { %v1274_v16 = vpop.eup %1273 }
 0x10d   :  { %v191_v17 = vadd.f32 1.0, %v1274_v16 }
 0x10f   :  { %1275 = vrcp.f32 %v191_v17 }
 0x119   :  { %v1276_v18 = vpop.eup %1275 }
 0x11a   :  { %v195_v21 = vmul.f32 0.0, %v1276_v18 }
 0x17d   :  { %v198_v19 = vpop.permute.xlu0 %197 }
 0x17e   :  { %v200_v20 = vmul.f32 %v1276_v18, %v198_v19 }
 0x180   :  { %202 = vrot.lane.b32.xlu0 %v200_v20, %s1403_s24 }
 0x1f2   :  { %v203_v22 = vpop.permute.xlu0 %202 }
 0x1f3   :  { %v205_v23 = vadd.f32 %v203_v22, %v195_v21 }
 0x1f5   :  { %1277 = vtanh.f32 %v205_v23 }
 0x1ff   :  { %v1278_v24 = vpop.eup %1277 }
 0x200   :  { %208 = vrot.lane.b32.xlu1 %v1278_v24, %s1402_s23 }
 0x272   :  { %v209_v27 = vpop.permute.xlu1 %208 }
 0x273   :  { %v211_v28 = vmul.f32 %v1276_v18, %v209_v27  ;;  %v85_v27 = vld [vmem:[#allocation2] sm:$0x3] }
 0x275   :  { %213 = vrot.lane.b32.xlu1 %v211_v28, %s1403_s24  ;;  %v88_v28 = vld [vmem:[%s87_s11] sm:$0x1] }
 0x276   :  { %89 = vst [vmem:[#allocation2] sm:$0x1] %v88_v28 }
 0x2e7   :  { %v214_v29 = vpop.permute.xlu1 %213 }
 0x2e8   :  { %1128 = vmatmul.mubr.msk.f32.vlgmr.msra.gmra.mrb[0].mxu1 %vm113_vm1, %v214_v29  ;;  %v92_v29 = vld [vmem:[%s91_s13] sm:$0x1] }
 0x2e9   :  { %1227 = vmatpush3.bf16.msra.mxu1 %v1471_v5  ;;  %1149 = vmatprep.mubr.msk.f32.mxu1 %vm1400_vm0, %v1401_v1  ;;  %93 = vst [vmem:[#allocation2 + $0x1] sm:$0x1] %v92_v29 }
 0x2ea   :  { %1228 = vmatprep.subr.bf16.mxu1 %v1399_v0 }
 0x2ed   :  { %1230 = vmatpush3.bf16.msra.mxu1 %v1474_v9 }
 0x2ee   :  { %1237 = vmatprep.subr.bf16.mxu1 %v1399_v0 }
 0x3bb   :  { %v283_v31 = vpop.f32.mrb[0].mxu1 }
 0x3bc   :  { %v287_v32 = vadd.f32 %v283_v31, %v58_v30  ;;  %v1129_v33 = vpop.f32.mrb[1].mxu1 }
 0x3be   :  { %1279 = vtanh.f32 %v287_v32  ;;  %v1048_v35 = vmul.f32 -1.442695, %v287_v32 }
 0x3c0   :  { %1281 = vpow2.f32 %v1048_v35 }
 0x3c8   :  { %v1280_v34 = vpop.eup %1279 }
 0x3c9   :  { %297 = vrot.lane.b32.xlu0 %v1280_v34, %s1402_s23 }
 0x3ca   :  { %v1282_v36 = vpop.eup %1281 }
 0x3cb   :  { %v291_v37 = vadd.f32 1.0, %v1282_v36 }
 0x3cd   :  { %1283 = vrcp.f32 %v291_v37 }
 0x3d7   :  { %v1284_v38 = vpop.eup %1283 }
 0x3d8   :  { %v295_v41 = vmul.f32 %v1284_v38, %v205_v23 }
 0x43b   :  { %v298_v39 = vpop.permute.xlu0 %297 }
 0x43c   :  { %v300_v40 = vmul.f32 %v1284_v38, %v298_v39 }
 0x43e   :  { %302 = vrot.lane.b32.xlu1 %v300_v40, %s1403_s24 }
 0x4b0   :  { %v303_v42 = vpop.permute.xlu1 %302 }
 0x4b1   :  { %v305_v43 = vadd.f32 %v303_v42, %v295_v41 }
 0x4b3   :  { %1285 = vtanh.f32 %v305_v43 }
 0x4bd   :  { %v1286_v44 = vpop.eup %1285 }
 0x4be   :  { %308 = vrot.lane.b32.xlu0 %v1286_v44, %s1402_s23 }
 0x530   :  { %v309_v47 = vpop.permute.xlu0 %308 }
 0x531   :  { %v311_v48 = vmul.f32 %v1284_v38, %v309_v47  ;;  %v94_v47 = vld [vmem:[#allocation2] sm:$0x3] }
 0x533   :  { %313 = vrot.lane.b32.xlu1 %v311_v48, %s1403_s24  ;;  %v97_v48 = vld [vmem:[%s96_s2] sm:$0x1] }
 0x534   :  { %98 = vst [vmem:[#allocation2] sm:$0x1] %v97_v48 }
 0x5a5   :  { %v314_v49 = vpop.permute.xlu1 %313 }
 0x5a6   :  { %1139 = vmatmul.mubr.msk.f32.vlgmr.msra.gmra.mrb[2].mxu0 %vm113_vm1, %v314_v49  ;;  %v101_v49 = vld [vmem:[%s100_s20] sm:$0x1] }
 0x5a7   :  { %1233 = vmatpush3.bf16.msra.mxu0 %v1471_v5  ;;  %1160 = vmatprep.mubr.msk.f32.mxu0 %vm1400_vm0, %v1401_v1  ;;  %102 = vst [vmem:[#allocation2 + $0x1] sm:$0x1] %v101_v49 }
 0x5a8   :  { %1234 = vmatprep.subr.bf16.mxu0 %v1399_v0 }
 0x5ab   :  { %1236 = vmatpush3.bf16.msra.mxu0 %v1474_v9 }
 0x5ac   :  { %1243 = vmatprep.subr.bf16.mxu0 %v1399_v0 }
 0x5ae   :  { %v103_v3 = vld [vmem:[#allocation2] sm:$0x3] }
 0x5af   :  { %107 = vst [vmem:[#allocation2] sm:$0x1] %v106_v4 }
 0x679   :  { %v383_v51 = vpop.f32.mrb[2].mxu0 }
 0x67a   :  { %v387_v52 = vadd.f32 %v383_v51, %v67_v50  ;;  %v1140_v53 = vpop.f32.mrb[3].mxu0 }
 0x67c   :  { %1287 = vtanh.f32 %v387_v52  ;;  %v1050_v55 = vmul.f32 -1.442695, %v387_v52 }
 0x67e   :  { %1289 = vpow2.f32 %v1050_v55 }
 0x686   :  { %v1288_v54 = vpop.eup %1287 }
 0x687   :  { %397 = vrot.lane.b32.xlu0 %v1288_v54, %s1402_s23 }
 0x688   :  { %v1290_v56 = vpop.eup %1289 }
 0x689   :  { %v391_v57 = vadd.f32 1.0, %v1290_v56 }
 0x68b   :  { %1291 = vrcp.f32 %v391_v57 }
 0x695   :  { %v1292_v58 = vpop.eup %1291 }
 0x696   :  { %v395_v61 = vmul.f32 %v1292_v58, %v305_v43 }
 0x6f9   :  { %v398_v59 = vpop.permute.xlu0 %397 }
 0x6fa   :  { %v400_v60 = vmul.f32 %v1292_v58, %v398_v59 }
 0x6fc   :  { %402 = vrot.lane.b32.xlu1 %v400_v60, %s1403_s24 }
 0x76e   :  { %v403_v62 = vpop.permute.xlu1 %402 }
 0x76f   :  { %v405_v63 = vadd.f32 %v403_v62, %v395_v61 }
 0x771   :  { %1293 = vtanh.f32 %v405_v63 }
 0x77b   :  { %v1294_v2 = vpop.eup %1293 }
 0x77c   :  { %408 = vrot.lane.b32.xlu0 %v1294_v2, %s1402_s23 }
 0x7ee   :  { %v409_v6 = vpop.permute.xlu0 %408 }
 0x7ef   :  { %v411_v7 = vmul.f32 %v1292_v58, %v409_v6  ;;  %v110_v6 = vld [vmem:[%s109_s30] sm:$0x1] }
 0x7f0   :  { %111 = vst [vmem:[#allocation2 + $0x1] sm:$0x1] %v110_v6 }
 0x7f1   :  { %413 = vrot.lane.b32.xlu1 %v411_v7, %s1403_s24 }
 0x863   :  { %v414_v12 = vpop.permute.xlu1 %413 }
 0x864   :  { %1150 = vmatmul.mubr.msk.f32.vlgmr.msra.gmra.mrb[2].mxu1 %vm113_vm1, %v414_v12 }
 0x865   :  { %1239 = vmatpush3.bf16.msra.mxu1 %v1471_v5  ;;  %1171 = vmatprep.mubr.msk.f32.mxu1 %vm1400_vm0, %v1401_v1 }
 0x866   :  { %1240 = vmatprep.subr.bf16.mxu1 %v1399_v0 }
 0x869   :  { %1242 = vmatpush3.bf16.msra.mxu1 %v1474_v9 }
 0x86a   :  { %1249 = vmatprep.subr.bf16.mxu1 %v1399_v0 }
 0x937   :  { %v483_v13 = vpop.f32.mrb[2].mxu1 }
 0x938   :  { %v487_v14 = vadd.f32 %v483_v13, %v76_v11  ;;  %v1151_v15 = vpop.f32.mrb[3].mxu1 }
 0x93a   :  { %1295 = vtanh.f32 %v487_v14  ;;  %v1052_v17 = vmul.f32 -1.442695, %v487_v14 }
 0x93c   :  { %1297 = vpow2.f32 %v1052_v17 }
 0x944   :  { %v1296_v16 = vpop.eup %1295 }
 0x945   :  { %497 = vrot.lane.b32.xlu0 %v1296_v16, %s1402_s23 }
 0x946   :  { %v1298_v18 = vpop.eup %1297 }
 0x947   :  { %v491_v19 = vadd.f32 1.0, %v1298_v18 }
 0x949   :  { %1299 = vrcp.f32 %v491_v19 }
 0x953   :  { %v1300_v20 = vpop.eup %1299 }
 0x954   :  { %v495_v23 = vmul.f32 %v1300_v20, %v405_v63 }
 0x9b7   :  { %v498_v21 = vpop.permute.xlu0 %497 }
 0x9b8   :  { %v500_v22 = vmul.f32 %v1300_v20, %v498_v21 }
 0x9ba   :  { %502 = vrot.lane.b32.xlu1 %v500_v22, %s1403_s24 }
 0xa2c   :  { %v503_v24 = vpop.permute.xlu1 %502 }
 0xa2d   :  { %v505_v25 = vadd.f32 %v503_v24, %v495_v23 }
 0xa2f   :  { %1301 = vtanh.f32 %v505_v25 }
 0xa39   :  { %v1302_v26 = vpop.eup %1301 }
 0xa3a   :  { %508 = vrot.lane.b32.xlu0 %v1302_v26, %s1402_s23 }
 0xaac   :  { %v509_v30 = vpop.permute.xlu0 %508 }
 0xaad   :  { %v511_v31 = vmul.f32 %v1300_v20, %v509_v30 }
 0xaaf   :  { %513 = vrot.lane.b32.xlu1 %v511_v31, %s1403_s24 }
 0xb21   :  { %v514_v32 = vpop.permute.xlu1 %513 }
 0xb22   :  { %1161 = vmatmul.mubr.msk.f32.vlgmr.msra.gmra.mrb[4].mxu0 %vm113_vm1, %v514_v32 }
 0xb23   :  { %1245 = vmatpush3.bf16.msra.mxu0 %v1471_v5  ;;  %1182 = vmatprep.mubr.msk.f32.mxu0 %vm1400_vm0, %v1401_v1 }
 0xb24   :  { %1246 = vmatprep.subr.bf16.mxu0 %v1399_v0 }
 0xb27   :  { %1248 = vmatpush3.bf16.msra.mxu0 %v1474_v9 }
 0xb28   :  { %1255 = vmatprep.subr.bf16.mxu0 %v1399_v0 }
 0xbf5   :  { %v583_v33 = vpop.f32.mrb[4].mxu0 }
 0xbf6   :  { %v587_v34 = vadd.f32 %v583_v33, %v85_v27  ;;  %v1162_v35 = vpop.f32.mrb[5].mxu0  ;;  %v112_v27 = vld [vmem:[#allocation2] sm:$0x3] }
 0xbf8   :  { %1303 = vtanh.f32 %v587_v34  ;;  %v1054_v37 = vmul.f32 -1.442695, %v587_v34 }
 0xbfa   :  { %1305 = vpow2.f32 %v1054_v37 }
 0xc02   :  { %v1304_v36 = vpop.eup %1303 }
 0xc03   :  { %597 = vrot.lane.b32.xlu0 %v1304_v36, %s1402_s23 }
 0xc04   :  { %v1306_v38 = vpop.eup %1305 }
 0xc05   :  { %v591_v39 = vadd.f32 1.0, %v1306_v38 }
 0xc07   :  { %1307 = vrcp.f32 %v591_v39 }
 0xc11   :  { %v1308_v40 = vpop.eup %1307 }
 0xc12   :  { %v595_v43 = vmul.f32 %v1308_v40, %v505_v25 }
 0xc75   :  { %v598_v41 = vpop.permute.xlu0 %597 }
 0xc76   :  { %v600_v42 = vmul.f32 %v1308_v40, %v598_v41  ;;  %v912_v41 = vld [vmem:[%s1634_s3] sm:$0xff] }
 0xc78   :  { %602 = vrot.lane.b32.xlu1 %v600_v42, %s1403_s24  ;;  %v913_v42 = vld [vmem:[%s1634_s3 + $0x8] sm:$0xff] }
 0xcea   :  { %v603_v44 = vpop.permute.xlu1 %602 }
 0xceb   :  { %v605_v45 = vadd.f32 %v603_v44, %v595_v43  ;;  %v914_v43 = vld [vmem:[%s1634_s3 + $0x10] sm:$0xff]  ;;  %v1256_v44 = vpack.c.bf16 %v913_v42, %v912_v41 }
 0xced   :  { %1309 = vtanh.f32 %v605_v45 }
 0xcf7   :  { %v1310_v46 = vpop.eup %1309 }
 0xcf8   :  { %608 = vrot.lane.b32.xlu0 %v1310_v46, %s1402_s23 }
 0xd6a   :  { %v609_v50 = vpop.permute.xlu0 %608 }
 0xd6b   :  { %v611_v51 = vmul.f32 %v1308_v40, %v609_v50 }
 0xd6d   :  { %613 = vrot.lane.b32.xlu1 %v611_v51, %s1403_s24  ;;  %v1061_v51 = vld [vmem:[%s1635_s4] ss:$0 sm:$0xff] }
 0xddf   :  { %v614_v52 = vpop.permute.xlu1 %613 }
 0xde0   :  { %1172 = vmatmul.mubr.msk.f32.vlgmr.msra.gmra.mrb[4].mxu1 %vm113_vm1, %v614_v52 }
 0xde1   :  { %1251 = vmatpush3.bf16.msra.mxu1 %v1471_v5  ;;  %1193 = vmatprep.mubr.msk.f32.mxu1 %vm1400_vm0, %v1401_v1 }
 0xde2   :  { %1252 = vmatprep.subr.bf16.mxu1 %v1399_v0 }
 0xde5   :  { %1254 = vmatpush3.bf16.msra.mxu1 %v1474_v9 }
 0xeb3   :  { %v683_v53 = vpop.f32.mrb[4].mxu1 }
 0xeb4   :  { %v687_v54 = vadd.f32 %v683_v53, %v94_v47  ;;  %v1173_v55 = vpop.f32.mrb[5].mxu1 }
 0xeb6   :  { %1311 = vtanh.f32 %v687_v54  ;;  %v1056_v57 = vmul.f32 -1.442695, %v687_v54 }
 0xeb8   :  { %1313 = vpow2.f32 %v1056_v57 }
 0xec0   :  { %v1312_v56 = vpop.eup %1311 }
 0xec1   :  { %697 = vrot.lane.b32.xlu0 %v1312_v56, %s1402_s23 }
 0xec2   :  { %v1314_v58 = vpop.eup %1313 }
 0xec3   :  { %v691_v59 = vadd.f32 1.0, %v1314_v58 }
 0xec5   :  { %1315 = vrcp.f32 %v691_v59 }
 0xecf   :  { %v1316_v5 = vpop.eup %1315 }
 0xed0   :  { %v695_v62 = vmul.f32 %v1316_v5, %v605_v45  ;;  %v915_v45 = vld [vmem:[%s1634_s3 + $0x18] sm:$0xff]  ;;  %s1404_s3 = smov [#allocation8]  }
 0xed1   :  { %v1259_v46 = vpack.c.bf16 %v915_v45, %v914_v43  ;;  %s1006_s14 = sshll.u32 %s1404_s3, 4  ;;  %s1007_s14 = int_to_ptr.vmem [resolvable:$true] %s1006_s14 }
 0xed2   :  { %p1372_p12 = scmp.lt.s32.totalorder %s1007_s14, %s1007_s14 }
 0xf33   :  { %v698_v60 = vpop.permute.xlu0 %697 }
 0xf34   :  { %v700_v61 = vmul.f32 %v1316_v5, %v698_v60 }
 0xf36   :  { %702 = vrot.lane.b32.xlu1 %v700_v61, %s1403_s24 }
 0xfa8   :  { %v703_v63 = vpop.permute.xlu1 %702 }
 0xfa9   :  { %v705_v9 = vadd.f32 %v703_v63, %v695_v62 }
 0xfab   :  { %1317 = vtanh.f32 %v705_v9 }
 0xfb5   :  { %v1318_v2 = vpop.eup %1317 }
 0xfb6   :  { %708 = vrot.lane.b32.xlu0 %v1318_v2, %s1402_s23 }
0x1028   :  { %v709_v7 = vpop.permute.xlu0 %708 }
0x1029   :  { %v711_v8 = vmul.f32 %v1316_v5, %v709_v7 }
0x102b   :  { %713 = vrot.lane.b32.xlu1 %v711_v8, %s1403_s24 }
0x109d   :  { %v714_v10 = vpop.permute.xlu1 %713 }
0x109e   :  { %1183 = vmatmul.mubr.msk.f32.vlgmr.msra.gmra.mrb[6].mxu0 %vm113_vm1, %v714_v10 }
0x109f   :  { %1204 = vmatprep.mubr.msk.f32.mxu0 %vm1400_vm0, %v1401_v1  ;;  %1257 = vmatpush3.bf16.msra.mxu0 %v1256_v44 }
0x10a0   :  { %1258 = vmatprep.subr.bf16.mxu0 %v1399_v0 }
0x10a3   :  { %1260 = vmatpush3.bf16.msra.mxu0 %v1259_v46 }
0x1171   :  { %v783_v11 = vpop.f32.mrb[6].mxu0 }
0x1172   :  { %v787_v12 = vadd.f32 %v783_v11, %v103_v3  ;;  %v1184_v13 = vpop.f32.mrb[7].mxu0 }
0x1174   :  { %1319 = vtanh.f32 %v787_v12  ;;  %v1058_v15 = vmul.f32 -1.442695, %v787_v12 }
0x1176   :  { %1321 = vpow2.f32 %v1058_v15 }
0x117e   :  { %v1320_v14 = vpop.eup %1319 }
0x117f   :  { %797 = vrot.lane.b32.xlu0 %v1320_v14, %s1402_s23 }
0x1180   :  { %v1322_v16 = vpop.eup %1321 }
0x1181   :  { %v791_v17 = vadd.f32 1.0, %v1322_v16 }
0x1183   :  { %1323 = vrcp.f32 %v791_v17 }
0x118d   :  { %v1324_v18 = vpop.eup %1323 }
0x118e   :  { %v795_v21 = vmul.f32 %v1324_v18, %v705_v9 }
0x11f1   :  { %v798_v19 = vpop.permute.xlu0 %797 }
0x11f2   :  { %v800_v20 = vmul.f32 %v1324_v18, %v798_v19 }
0x11f4   :  { %802 = vrot.lane.b32.xlu1 %v800_v20, %s1403_s24 }
0x1266   :  { %v803_v22 = vpop.permute.xlu1 %802 }
0x1267   :  { %v805_v1 = vadd.f32 %v803_v22, %v795_v21 }
0x1269   :  { %1325 = vtanh.f32 %v805_v1 }
0x1273   :  { %v1326_v23 = vpop.eup %1325 }
0x1274   :  { %808 = vrot.lane.b32.xlu0 %v1326_v23, %s1402_s23 }
0x12e6   :  { %v809_v24 = vpop.permute.xlu0 %808 }
0x12e7   :  { %v811_v25 = vmul.f32 %v1324_v18, %v809_v24 }
0x12e9   :  { %813 = vrot.lane.b32.xlu1 %v811_v25, %s1403_s24 }
0x135b   :  { %v814_v26 = vpop.permute.xlu1 %813 }
0x135c   :  { %1194 = vmatmul.mubr.msk.f32.vlgmr.msra.gmra.mrb[6].mxu1 %vm113_vm1, %v814_v26 }
0x142f   :  { %v883_v28 = vpop.f32.mrb[6].mxu1 }
0x1430   :  { %v887_v29 = vadd.f32 %v883_v28, %v112_v27  ;;  %v1195_v30 = vpop.f32.mrb[7].mxu1 }
0x1432   :  { %1327 = vtanh.f32 %v887_v29  ;;  %v1060_v32 = vmul.f32 -1.442695, %v887_v29 }
0x1434   :  { %1329 = vpow2.f32 %v1060_v32 }
0x143c   :  { %v1328_v31 = vpop.eup %1327 }
0x143d   :  { %897 = vrot.lane.b32.xlu0 %v1328_v31, %s1402_s23 }
0x143e   :  { %v1330_v33 = vpop.eup %1329 }
0x143f   :  { %v891_v34 = vadd.f32 1.0, %v1330_v33 }
0x1441   :  { %1331 = vrcp.f32 %v891_v34 }
0x144b   :  { %v1332_v35 = vpop.eup %1331 }
0x144c   :  { %v895_v38 = vmul.f32 %v1332_v35, %v805_v1 }
0x14af   :  { %v898_v36 = vpop.permute.xlu0 %897 }
0x14b0   :  { %v900_v37 = vmul.f32 %v1332_v35, %v898_v36 }
0x14b2   :  { %902 = vrot.lane.b32.xlu1 %v900_v37, %s1403_s24 }
0x1524   :  { %v903_v39 = vpop.permute.xlu1 %902 }
0x1525   :  { %v905_v40 = vadd.f32 %v903_v39, %v895_v38 }
0x1527   :  { %1333 = vtanh.f32 %v905_v40 }
0x1531   :  { %v1334_v47 = vpop.eup %1333 }
0x1532   :  { %908 = vrot.lane.b32.xlu0 %v1334_v47, %s1402_s23  ;;  %s1367_s23 = scalar_lea.vmem %s1007_s14, 32 }
0x1533   :  { %p1368_p11 = scmp.ne.s32.totalorder %s1007_s14, %s1367_s23  ;;  %p1373_p13 = scmp.lt.s32.totalorder %s1367_s23, %s1367_s23 }
0x1535   :  { %p1374_p0 = por %p1373_p13, %p1372_p12 }
0x1537   :  { %p1375_p1 = pnand %p1374_p0, %p1368_p11 }
0x15a4   :  { %v909_v48 = vpop.permute.xlu0 %908 }
0x15a5   :  { %v911_v49 = vmul.f32 %v1332_v35, %v909_v48 }
0x15a7   :  { %924 = vrot.lane.b32.xlu1 %v911_v49, %s1403_s24 }
0x1619   :  { %v925_v50 = vpop.permute.xlu1 %924 }
0x161a   :  { %1205 = vmatmul.mubr.msk.f32.vlgmr.msra.gmra.mrb[8].mxu0 %vm113_vm1, %v925_v50 }
0x16ed   :  { %v994_v52 = vpop.f32.mrb[8].mxu0 }
0x16ee   :  { %v995_v0 = vadd.f32 %v1061_v51, %v994_v52  ;;  %v1206_v53 = vpop.f32.mrb[9].mxu0 }
0x16f0   :  { %999 = vst.msk [vmem:[#allocation8] sm:$0x3] %vm998_vm2, %v995_v0 }
0x16f1   :  { %1378 = shalt.err (!%p1375_p1)
}
0x16f2   :  { %s1379_s16 = scalar_lea.hbm %s1636_s5, 32 }
0x16f3   :  { %p1380_p2 = scmp.ne.s32.totalorder %s1636_s5, %s1379_s16  ;;  %p1383_p3 = scmp.lt.u32.totalorder %s1379_s16, %s1636_s5 }
0x16f5   :  { %p1385_p4 = pnand %p1383_p3, %p1380_p2 }
0x16f7   :  { %1388 = shalt.err (!%p1385_p4)
}
0x16f8   :  { %1009 = dma.vmem_to_hbm [thread:$0]  %s1007_s14, 32, %s1636_s5, [#allocation7]  }
0x16f9   :  { %1393 = dma.done.wait [#allocation7], 32  }
0x16fa   :  { %1394 = vsyncadd [#allocation7], 4294967264 }
0x16fb   :  { %1013 = vsyncpa [#allocation6], 1 }
0x16fc   :  { %1014 = vsyncpa [#allocation7], 1 }

</bundles_post_ra>
